<compile_context>
chip_gen: v6e
topology: v6e:2x2x1
jax: 0.10.0
libtpu: 0.0.40
codegen_flags: <defaults>
</compile_context>

<pallas_src>
import functools

import jax
import jax.numpy as jnp
from jax.experimental import pallas as pl
from jax.experimental.pallas import tpu as pltpu

NUM_FEATURES = 1024     # hidden width of dense1 (module constant)
N_OBS = 64              # dim_room = (8, 8) -> one-hot length dim_x * dim_y
ACTION_SPACE = 9        # len(SokobanEnv.get_action_lookup()) for gym-sokoban
BATCH = 8

LANE = 128              # TPU lane width; fused-head / output-slab lane count
POLICY_OFFSET = LANE // 2   # lane where the softmax policy is packed in the slab


def _round_up(x, m):
    return (x + m - 1) // m * m


def sokoban_kernel(data_ref,           # [bm, 1] int32  (VMEM block of state indices)
                   w1_ref,             # [N_OBS, NUM_FEATURES] (VMEM, resident)
                   b1_ref,             # [1, NUM_FEATURES]     f32
                   wh_ref,             # [NUM_FEATURES, LANE]  (fused p/v heads, resident)
                   bh_ref,             # [1, LANE]             f32
                   out_ref,            # [bm, LANE]            f32 output slab
                   *, action_space):
    # --- vectorized one-hot: index column vs. lane iota (VPU), no serial gather ---
    idx = data_ref[...]                                             # [bm, 1] int32
    obs_id = jax.lax.broadcasted_iota(jnp.int32, (idx.shape[0], N_OBS), 1)
    one_hot = (idx == obs_id).astype(jnp.float32)                   # [bm, N_OBS]

    # --- h_relu = relu(dense1(one_hot)) : [bm,64] x [64,1024] on the MXU ---
    h = jnp.dot(one_hot, w1_ref[...].astype(jnp.float32),
                preferred_element_type=jnp.float32)
    h = jnp.maximum(h + b1_ref[...].astype(jnp.float32), 0.0)       # [bm, 1024]

    # --- fused heads: lanes [0, A) = dense_p logits, lane A = dense_v value ---
    hv = jnp.dot(h, wh_ref[...].astype(jnp.float32),
                 preferred_element_type=jnp.float32)
    hv = hv + bh_ref[...].astype(jnp.float32)                       # lanes > A are exactly 0

    # --- policy = softmax(logits) over the first `action_space` lanes (exact norm) ---
    lane = jax.lax.broadcasted_iota(jnp.int32, hv.shape, 1)
    valid = lane < action_space
    masked = jnp.where(valid, hv, -jnp.inf)
    m = jnp.max(masked, axis=1, keepdims=True)
    e = jnp.exp(masked - m)                                          # exactly 0 on masked lanes
    policy = e / jnp.sum(e, axis=1, keepdims=True)                   # lanes >= A stay 0

    # --- single lane-dense store: [logits | value | 0.. | policy@lane64 | 0..] ---
    out_ref[...] = hv + pltpu.roll(policy, shift=POLICY_OFFSET, axis=1)


def sokoban_forward(data, params, *, block_rows=256, weight_dtype=jnp.float32):
    """data: int array [N] of state indices; returns (logits, policy, value)."""
    w1, b1, wp, bp, wv, bv = params
    n = data.shape[0]
    a = wp.shape[1]
    assert a + 1 <= POLICY_OFFSET and POLICY_OFFSET + a <= LANE

    # Fuse dense_p / dense_v into one lane-padded head weight/bias.
    pad = LANE - (a + 1)
    w_head = jnp.concatenate(
        [wp, wv, jnp.zeros((w1.shape[1], pad), jnp.float32)], axis=1)
    b_head = jnp.concatenate([bp, bv, jnp.zeros((1, pad), jnp.float32)], axis=1)

    # Optional narrow weight storage (halves the dominant weight DMA); f32 by default
    # to keep bit-fidelity with the PyTorch module.
    w1_s = w1.astype(weight_dtype)
    w_head_s = w_head.astype(weight_dtype)

    # Batch blocking: sublane-aligned; 256 rows fills the v6e/v7x MXU, and the cap at
    # ceil(n/2) keeps >= 2 grid steps on big batches so "parallel" shards across the
    # two v7x TensorCores.  Weights stay resident via constant index_maps.
    bm = min(block_rows, max(8, _round_up((n + 1) // 2, 8)))
    n_pad = _round_up(n, bm)
    # Pad with index 0; padded rows are sliced away in the wrapper.
    data_pad = jnp.zeros((n_pad, 1), jnp.int32).at[:n, 0].set(data.astype(jnp.int32))
    grid = (n_pad // bm,)

    w_bytes = (w1_s.size * w1_s.dtype.itemsize + b1.size * 4
               + w_head_s.size * w_head_s.dtype.itemsize + b_head.size * 4)
    cost = pl.CostEstimate(
        flops=(2 * n_pad * N_OBS * NUM_FEATURES           # one-hot matmul
               + 2 * n_pad * NUM_FEATURES * LANE          # fused head matmul
               + 4 * n_pad * NUM_FEATURES),               # bias + relu
        transcendentals=n_pad * LANE,
        bytes_accessed=int(n_pad * 4 + w_bytes + n_pad * LANE * 4),
    )

    out = pl.pallas_call(
        functools.partial(sokoban_kernel, action_space=a),
        out_shape=jax.ShapeDtypeStruct((n_pad, LANE), jnp.float32),
        grid=grid,
        in_specs=[
            pl.BlockSpec((bm, 1), lambda i: (i, 0)),          # state indices (VMEM)
            pl.BlockSpec(w1_s.shape, lambda i: (0, 0)),       # resident weights
            pl.BlockSpec(b1.shape, lambda i: (0, 0)),
            pl.BlockSpec(w_head_s.shape, lambda i: (0, 0)),
            pl.BlockSpec(b_head.shape, lambda i: (0, 0)),
        ],
        out_specs=pl.BlockSpec((bm, LANE), lambda i: (i, 0)),
        compiler_params=pltpu.CompilerParams(
            dimension_semantics=("parallel",)),
        cost_estimate=cost,
    )(data_pad, w1_s, b1, w_head_s, b_head)

    logits = out[:n, :a]
    policy = out[:n, POLICY_OFFSET:POLICY_OFFSET + a]
    value = out[:n, a]                                # .view(-1)
    return logits, policy, value


def init_params(key):
    """Deterministic PyTorch-default-style (uniform +-1/sqrt(fan_in)) init."""
    def linear(kw, kb, fan_in, fan_out):
        bound = fan_in ** -0.5
        w = jax.random.uniform(kw, (fan_in, fan_out), jnp.float32, -bound, bound)
        b = jax.random.uniform(kb, (1, fan_out), jnp.float32, -bound, bound)
        return w, b

    ks = jax.random.split(key, 6)
    w1, b1 = linear(ks[0], ks[1], N_OBS, NUM_FEATURES)         # dense1
    wp, bp = linear(ks[2], ks[3], NUM_FEATURES, ACTION_SPACE)  # dense_p
    wv, bv = linear(ks[4], ks[5], NUM_FEATURES, 1)             # dense_v
    return (w1, b1, wp, bp, wv, bv)


def reference_forward(data, params):
    """Plain-JAX reference of the same forward (HIGHEST precision), for checking."""
    w1, b1, wp, bp, wv, bv = params
    hp = jax.lax.Precision.HIGHEST
    one_hot = jax.nn.one_hot(data, N_OBS, dtype=jnp.float32)
    h = jnp.maximum(jnp.dot(one_hot, w1, precision=hp) + b1, 0.0)
    logits = jnp.dot(h, wp, precision=hp) + bp
    policy = jax.nn.softmax(logits, axis=1)
    value = (jnp.dot(h, wv, precision=hp) + bv).reshape(-1)
    return logits, policy, value


if __name__ == "__main__":
    key = jax.random.PRNGKey(0)
    k_data, k_params = jax.random.split(key)

    params = init_params(k_params)
    data = jax.random.randint(k_data, (BATCH,), 0, N_OBS, dtype=jnp.int32)

    logits, policy, value = sokoban_forward(data, params)
    jax.block_until_ready((logits, policy, value))

    # sanity check against the pure-JAX reference
    ref_logits, ref_policy, ref_value = reference_forward(data, params)
    assert logits.shape == (BATCH, ACTION_SPACE)
    assert policy.shape == (BATCH, ACTION_SPACE)
    assert value.shape == (BATCH,)
    assert jnp.allclose(logits, ref_logits, atol=1e-3), "logits mismatch"
    assert jnp.allclose(policy, ref_policy, atol=5e-3), "policy mismatch"
    assert jnp.allclose(value, ref_value, atol=1e-3), "value mismatch"

    print("KERNEL_OK")
</pallas_src>

<mosaic_0001>
module attributes {stable_mosaic.version = 11 : i64} {
  func.func @sokoban_kernel(%arg0: i32, %arg1: memref<8x1xi32, #tpu.memory_space<vmem>>, %arg2: memref<64x1024xf32, #tpu.memory_space<vmem>>, %arg3: memref<1x1024xf32, #tpu.memory_space<vmem>>, %arg4: memref<1024x128xf32, #tpu.memory_space<vmem>>, %arg5: memref<1x128xf32, #tpu.memory_space<vmem>>, %arg6: memref<8x128xf32, #tpu.memory_space<vmem>>) attributes {dimension_semantics = [#tpu.dimension_semantics<parallel>], iteration_bounds = array<i64: 1>, scalar_prefetch = 0 : i64, scratch_operands = 0 : i64, tpu.core_type = #tpu.core_type<tc>, window_params = [{transform_indices = @transform_0, window_bounds = array<i64: 8, 1>}, {pipeline_mode = #tpu.pipeline_mode<synchronous>, transform_indices = @transform_1, window_bounds = array<i64: 64, 1024>}, {pipeline_mode = #tpu.pipeline_mode<synchronous>, transform_indices = @transform_2, window_bounds = array<i64: 1, 1024>}, {pipeline_mode = #tpu.pipeline_mode<synchronous>, transform_indices = @transform_3, window_bounds = array<i64: 1024, 128>}, {pipeline_mode = #tpu.pipeline_mode<synchronous>, transform_indices = @transform_4, window_bounds = array<i64: 1, 128>}, {transform_indices = @transform_5, window_bounds = array<i64: 8, 128>}]} {
    %c0 = arith.constant 0 : index
    %c0_0 = arith.constant 0 : index
    %0 = vector.load %arg1[%c0, %c0_0] : memref<8x1xi32, #tpu.memory_space<vmem>>, vector<8x1xi32>
    %1 = tpu.iota {dimensions = array<i32: 1>} : vector<8x64xi32>
    %2 = vector.broadcast %0 : vector<8x1xi32> to vector<8x64xi32>
    %3 = arith.cmpi eq, %2, %1 : vector<8x64xi32>
    %4 = arith.extui %3 : vector<8x64xi1> to vector<8x64xi32>
    %5 = arith.sitofp %4 : vector<8x64xi32> to vector<8x64xf32>
    %c0_1 = arith.constant 0 : index
    %c0_2 = arith.constant 0 : index
    %6 = vector.load %arg2[%c0_1, %c0_2] : memref<64x1024xf32, #tpu.memory_space<vmem>>, vector<64x1024xf32>
    %cst = arith.constant dense<0.000000e+00> : vector<8x1024xf32>
    %7 = tpu.matmul %5, %6, %cst {dimension_numbers = #tpu.dot_dimension_numbers<[1], [0], [0], [1], [0, 0, 1, 1], [], []>} : vector<8x64xf32>, vector<64x1024xf32>, vector<8x1024xf32> -> vector<8x1024xf32>
    %c0_3 = arith.constant 0 : index
    %c0_4 = arith.constant 0 : index
    %8 = vector.load %arg3[%c0_3, %c0_4] : memref<1x1024xf32, #tpu.memory_space<vmem>>, vector<1x1024xf32>
    %9 = vector.broadcast %8 : vector<1x1024xf32> to vector<8x1024xf32>
    %10 = arith.addf %7, %9 : vector<8x1024xf32>
    %cst_5 = arith.constant 0.000000e+00 : f32
    %11 = vector.broadcast %cst_5 : f32 to vector<8x1024xf32>
    %12 = arith.maximumf %10, %11 : vector<8x1024xf32>
    %c0_6 = arith.constant 0 : index
    %c0_7 = arith.constant 0 : index
    %13 = vector.load %arg4[%c0_6, %c0_7] : memref<1024x128xf32, #tpu.memory_space<vmem>>, vector<1024x128xf32>
    %cst_8 = arith.constant dense<0.000000e+00> : vector<8x128xf32>
    %14 = tpu.matmul %12, %13, %cst_8 {dimension_numbers = #tpu.dot_dimension_numbers<[1], [0], [0], [1], [0, 0, 1, 1], [], []>} : vector<8x1024xf32>, vector<1024x128xf32>, vector<8x128xf32> -> vector<8x128xf32>
    %c0_9 = arith.constant 0 : index
    %c0_10 = arith.constant 0 : index
    %15 = vector.load %arg5[%c0_9, %c0_10] : memref<1x128xf32, #tpu.memory_space<vmem>>, vector<1x128xf32>
    %16 = vector.broadcast %15 : vector<1x128xf32> to vector<8x128xf32>
    %17 = arith.addf %14, %16 : vector<8x128xf32>
    %18 = tpu.iota {dimensions = array<i32: 1>} : vector<8x128xi32>
    %c9_i32 = arith.constant 9 : i32
    %19 = vector.broadcast %c9_i32 : i32 to vector<8x128xi32>
    %20 = arith.cmpi slt, %18, %19 : vector<8x128xi32>
    %cst_11 = arith.constant 0xFF800000 : f32
    %21 = vector.broadcast %cst_11 : f32 to vector<8x128xf32>
    %22 = arith.select %20, %17, %21 : vector<8x128xi1>, vector<8x128xf32>
    %cst_12 = arith.constant dense<0xFF800000> : vector<8xf32>
    %23 = vector.multi_reduction <maximumf>, %22, %cst_12 [1] : vector<8x128xf32> to vector<8xf32>
    %24 = vector.shape_cast %23 : vector<8xf32> to vector<8x1xf32>
    %25 = vector.broadcast %24 : vector<8x1xf32> to vector<8x128xf32>
    %26 = arith.subf %22, %25 : vector<8x128xf32>
    %27 = math.exp %26 : vector<8x128xf32>
    %cst_13 = arith.constant dense<0.000000e+00> : vector<8xf32>
    %28 = vector.multi_reduction <add>, %27, %cst_13 [1] : vector<8x128xf32> to vector<8xf32>
    %29 = vector.shape_cast %28 : vector<8xf32> to vector<8x1xf32>
    %30 = vector.broadcast %29 : vector<8x1xf32> to vector<8x128xf32>
    %31 = arith.divf %27, %30 : vector<8x128xf32>
    %c64_i32 = arith.constant 64 : i32
    %32 = tpu.dynamic_rotate %31 by %c64_i32 dim 1 : vector<8x128xf32>, i32 -> vector<8x128xf32>
    %33 = arith.addf %17, %32 : vector<8x128xf32>
    %c0_14 = arith.constant 0 : index
    %c0_15 = arith.constant 0 : index
    %34 = vector.load %arg6[%c0_14, %c0_15] : memref<8x128xf32, #tpu.memory_space<vmem>>, vector<8x128xf32>
    tpu.vector_store %arg6[%c0_14, %c0_15], %33 {strides = array<i32>} : memref<8x128xf32, #tpu.memory_space<vmem>>, vector<8x128xf32>,
    return
  }
  func.func @transform_0(%arg0: i32) -> (i32, i32) {
    %c0_i32 = arith.constant 0 : i32
    %c0_i32_0 = arith.constant 0 : i32
    return %arg0, %c0_i32 : i32, i32
  }
  func.func @transform_1(%arg0: i32) -> (i32, i32) {
    %c0_i32 = arith.constant 0 : i32
    %c0_i32_0 = arith.constant 0 : i32
    %c0_i32_1 = arith.constant 0 : i32
    return %c0_i32, %c0_i32_0 : i32, i32
  }
  func.func @transform_2(%arg0: i32) -> (i32, i32) {
    %c0_i32 = arith.constant 0 : i32
    %c0_i32_0 = arith.constant 0 : i32
    %c0_i32_1 = arith.constant 0 : i32
    return %c0_i32, %c0_i32_0 : i32, i32
  }
  func.func @transform_3(%arg0: i32) -> (i32, i32) {
    %c0_i32 = arith.constant 0 : i32
    %c0_i32_0 = arith.constant 0 : i32
    %c0_i32_1 = arith.constant 0 : i32
    return %c0_i32, %c0_i32_0 : i32, i32
  }
  func.func @transform_4(%arg0: i32) -> (i32, i32) {
    %c0_i32 = arith.constant 0 : i32
    %c0_i32_0 = arith.constant 0 : i32
    %c0_i32_1 = arith.constant 0 : i32
    return %c0_i32, %c0_i32_0 : i32, i32
  }
  func.func @transform_5(%arg0: i32) -> (i32, i32) {
    %c0_i32 = arith.constant 0 : i32
    %c0_i32_0 = arith.constant 0 : i32
    return %arg0, %c0_i32 : i32, i32
  }
}

</mosaic_0001>

<bundles_post_ra>
// kernel: tpu_custom_call.1
= control target key start
LH: loop header
LB: loop body
LE: loop exit
PB: predicated region body
PF: predicated region fallthrough
CT: control target
= control target key end

     0   :  { %10 = vsyncpa [#allocation3], 0  ;;  %s1238_s0 = inlined_call_operand.vmem [shape: s32[8,1], index: 0, kind: input, shape index: {}]   ;;  %s1239_s1 = inlined_call_operand.hbm [shape: f32[64,1024], index: 1, kind: input, shape index: {}]   ;;  %s1240_s2 = inlined_call_operand.vmem [shape: f32[1,1024], index: 2, kind: input, shape index: {}]   ;;  %s1241_s3 = inlined_call_operand.hbm [shape: f32[1024,128], index: 3, kind: input, shape index: {}]   ;;  %s1242_s4 = inlined_call_operand.vmem [shape: f32[1,128], index: 4, kind: input, shape index: {}]   ;;  %s1243_s5 = inlined_call_operand.hbm [shape: f32[8,128], index: 5, kind: output, shape index: {}]  }
   0x1   :  { %11 = vsyncpa [#allocation6], 0 }
   0x2   :  { %12 = vsyncpa [#allocation4], 0  ;;  %s1132_s18 = smov [#allocation2]  }
   0x3   :  { %s20_s19 = sshll.u32 %s1132_s18, 4  ;;  %s21_s19 = int_to_ptr.vmem [resolvable:$true] %s20_s19 }
   0x4   :  { %s1074_s20 = scalar_lea.vmem %s21_s19, 8192  ;;  %p1079_p1 = scmp.lt.s32.totalorder %s21_s19, %s21_s19 }
   0x5   :  { %p1075_p0 = scmp.ne.s32.totalorder %s21_s19, %s1074_s20  ;;  %p1080_p2 = scmp.lt.s32.totalorder %s1074_s20, %s1074_s20 }
   0x7   :  { %p1081_p3 = por %p1080_p2, %p1079_p1 }
   0x9   :  { %p1082_p4 = pnand %p1081_p3, %p1075_p0 }
   0xb   :  { %1085 = shalt.err (!%p1082_p4)
}
   0xc   :  { %s1133_s21 = smov 1024   ;;  %s1134_s22 = smov 64  }
   0xd   :  { %26 = dma.hbm_to_vmem [thread:$0]  %s1239_s1, 8192, %s21_s19, [#allocation3], %s1133_s21, %s1133_s21, %s1134_s22  }
   0xe   :  { %s1135_s25 = smov [#allocation5]  }
   0xf   :  { %s34_s26 = sshll.u32 %s1135_s25, 4  ;;  %s35_s26 = int_to_ptr.vmem [resolvable:$true] %s34_s26 }
  0x10   :  { %s1094_s27 = scalar_lea.vmem %s35_s26, 16384  ;;  %p1099_p6 = scmp.lt.s32.totalorder %s35_s26, %s35_s26 }
  0x11   :  { %p1095_p5 = scmp.ne.s32.totalorder %s35_s26, %s1094_s27  ;;  %p1100_p7 = scmp.lt.s32.totalorder %s1094_s27, %s1094_s27 }
  0x13   :  { %p1101_p8 = por %p1100_p7, %p1099_p6 }
  0x15   :  { %p1102_p9 = pnand %p1101_p8, %p1095_p5 }
  0x17   :  { %1105 = shalt.err (!%p1102_p9)
}
  0x18   :  { %s1136_s28 = smov 128   ;;  %s1137_s29 = smov 8  }
  0x19   :  { %40 = dma.hbm_to_vmem [thread:$0]  %s1241_s3, 16384, %s35_s26, [#allocation6], %s1136_s28, %s1136_s28, %s1137_s29  }
  0x1a   :  { %1126 = dma.done.wait [#allocation3], 8192  }
  0x1b   :  { %1127 = vsyncadd [#allocation3], 4294959104 }
  0x1c   :  { %1128 = dma.done.wait [#allocation6], 16384  }
  0x1d   :  { %1129 = vsyncadd [#allocation6], 4294950912  ;;  %v1138_v0 = vmov 0   ;;  %v1139_v1 = vmov 0.0   ;;  %v49_v2 = vld [vmem:[%s1238_s0] sm:$0xff]  ;;  %v115_v3 = vld [vmem:[#allocation2 + $0x1c8] sm:$0xff]  ;;  %v50_v37 = vlaneseq }
  0x1e   :  { %1061 = vset.pattern.permute.xlu0 %v1138_v0  ;;  %232 = vmatprep.mubr.f32.mxu0 %v1139_v1  ;;  %v117_v4 = vld [vmem:[#allocation2 + $0x1d8] sm:$0xff]  ;;  %v114_v5 = vld [vmem:[#allocation2 + $0x1c0] sm:$0xff]  ;;  %v116_v6 = vld [vmem:[#allocation2 + $0x1d0] sm:$0xff]  ;;  %vm164_vm0 = vcmask 523264  }
  0x1f   :  { %303 = vmatprep.mubr.f32.mxu1 %v1139_v1  ;;  %53 = vperm.xlu0 %1061, %v49_v2   ;;  %v107_v7 = vld [vmem:[#allocation2 + $0x188] sm:$0xff]  ;;  %v109_v8 = vld [vmem:[#allocation2 + $0x198] sm:$0xff]  ;;  %v106_v9 = vld [vmem:[#allocation2 + $0x180] sm:$0xff]  ;;  %v1184_v38 = vand.u32 127, %v50_v37 }
  0x20   :  { %184 = vmatprep.subr.mxu0 %v115_v3  ;;  %255 = vmatprep.subr.mxu1 %v117_v4  ;;  %v108_v10 = vld [vmem:[#allocation2 + $0x190] sm:$0xff]  ;;  %v99_v11 = vld [vmem:[#allocation2 + $0x148] sm:$0xff]  ;;  %v101_v12 = vld [vmem:[#allocation2 + $0x158] sm:$0xff] }
  0x21   :  { %185 = vmatpush1.msra.mxu0 %v114_v5  ;;  %256 = vmatpush1.msra.mxu1 %v116_v6  ;;  %v98_v13 = vld [vmem:[#allocation2 + $0x140] sm:$0xff]  ;;  %v100_v14 = vld [vmem:[#allocation2 + $0x150] sm:$0xff]  ;;  %v91_v15 = vld [vmem:[#allocation2 + $0x108] sm:$0xff]  ;;  %vm875_vm2 = vcmp.lt.s32.totalorder %v1184_v38, 9 }
  0x22   :  { %186 = vmatprep.subr.mxu0 %v107_v7  ;;  %257 = vmatprep.subr.mxu1 %v109_v8  ;;  %v93_v16 = vld [vmem:[#allocation2 + $0x118] sm:$0xff]  ;;  %v90_v17 = vld [vmem:[#allocation2 + $0x100] sm:$0xff]  ;;  %v92_v18 = vld [vmem:[#allocation2 + $0x110] sm:$0xff] }
  0x23   :  { %187 = vmatpush1.msra.mxu0 %v106_v9  ;;  %258 = vmatpush1.msra.mxu1 %v108_v10  ;;  %v83_v19 = vld [vmem:[#allocation2 + $0xc8] sm:$0xff]  ;;  %v85_v20 = vld [vmem:[#allocation2 + $0xd8] sm:$0xff]  ;;  %v82_v21 = vld [vmem:[#allocation2 + $0xc0] sm:$0xff] }
  0x24   :  { %188 = vmatprep.subr.mxu0 %v99_v11  ;;  %259 = vmatprep.subr.mxu1 %v101_v12  ;;  %v84_v22 = vld [vmem:[#allocation2 + $0xd0] sm:$0xff]  ;;  %v75_v23 = vld [vmem:[#allocation2 + $0x88] sm:$0xff]  ;;  %v77_v24 = vld [vmem:[#allocation2 + $0x98] sm:$0xff] }
  0x25   :  { %189 = vmatpush1.msra.mxu0 %v98_v13  ;;  %260 = vmatpush1.msra.mxu1 %v100_v14  ;;  %v74_v25 = vld [vmem:[#allocation2 + $0x80] sm:$0xff]  ;;  %v76_v26 = vld [vmem:[#allocation2 + $0x90] sm:$0xff]  ;;  %v67_v27 = vld [vmem:[#allocation2 + $0x48] sm:$0xff] }
  0x26   :  { %190 = vmatprep.subr.mxu0 %v91_v15  ;;  %261 = vmatprep.subr.mxu1 %v93_v16  ;;  %v69_v28 = vld [vmem:[#allocation2 + $0x58] sm:$0xff]  ;;  %v66_v29 = vld [vmem:[#allocation2 + $0x40] sm:$0xff]  ;;  %v68_v30 = vld [vmem:[#allocation2 + $0x50] sm:$0xff] }
  0x27   :  { %191 = vmatpush1.msra.mxu0 %v90_v17  ;;  %262 = vmatpush1.msra.mxu1 %v92_v18  ;;  %v59_v31 = vld [vmem:[#allocation2 + $0x8] sm:$0xff]  ;;  %v61_v32 = vld [vmem:[#allocation2 + $0x18] sm:$0xff]  ;;  %v58_v33 = vld [vmem:[#allocation2] sm:$0xff] }
  0x28   :  { %192 = vmatprep.subr.mxu0 %v83_v19  ;;  %263 = vmatprep.subr.mxu1 %v85_v20  ;;  %v60_v34 = vld [vmem:[#allocation2 + $0x10] sm:$0xff]  ;;  %v119_v35 = vld [vmem:[#allocation2 + $0x1e8] sm:$0xff]  ;;  %v121_v36 = vld [vmem:[#allocation2 + $0x1f8] sm:$0xff] }
  0x29   :  { %193 = vmatpush1.msra.mxu0 %v82_v21  ;;  %264 = vmatpush1.msra.mxu1 %v84_v22  ;;  %v118_v40 = vld [vmem:[#allocation2 + $0x1e0] sm:$0xff]  ;;  %v120_v41 = vld [vmem:[#allocation2 + $0x1f0] sm:$0xff]  ;;  %v111_v43 = vld [vmem:[#allocation2 + $0x1a8] sm:$0xff] }
  0x2a   :  { %194 = vmatprep.subr.mxu0 %v75_v23  ;;  %265 = vmatprep.subr.mxu1 %v77_v24  ;;  %v113_v44 = vld [vmem:[#allocation2 + $0x1b8] sm:$0xff]  ;;  %v110_v45 = vld [vmem:[#allocation2 + $0x1a0] sm:$0xff]  ;;  %v112_v46 = vld [vmem:[#allocation2 + $0x1b0] sm:$0xff] }
  0x2b   :  { %195 = vmatpush1.msra.mxu0 %v74_v25  ;;  %266 = vmatpush1.msra.mxu1 %v76_v26  ;;  %v103_v47 = vld [vmem:[#allocation2 + $0x168] sm:$0xff]  ;;  %v105_v48 = vld [vmem:[#allocation2 + $0x178] sm:$0xff]  ;;  %v102_v49 = vld [vmem:[#allocation2 + $0x160] sm:$0xff] }
  0x2c   :  { %196 = vmatprep.subr.mxu0 %v67_v27  ;;  %267 = vmatprep.subr.mxu1 %v69_v28  ;;  %v104_v50 = vld [vmem:[#allocation2 + $0x170] sm:$0xff]  ;;  %v95_v51 = vld [vmem:[#allocation2 + $0x128] sm:$0xff]  ;;  %v97_v52 = vld [vmem:[#allocation2 + $0x138] sm:$0xff] }
  0x2d   :  { %197 = vmatpush1.msra.mxu0 %v66_v29  ;;  %268 = vmatpush1.msra.mxu1 %v68_v30  ;;  %v94_v53 = vld [vmem:[#allocation2 + $0x120] sm:$0xff]  ;;  %v96_v54 = vld [vmem:[#allocation2 + $0x130] sm:$0xff]  ;;  %v87_v55 = vld [vmem:[#allocation2 + $0xe8] sm:$0xff] }
  0x2e   :  { %198 = vmatprep.subr.mxu0 %v59_v31  ;;  %269 = vmatprep.subr.mxu1 %v61_v32  ;;  %v89_v56 = vld [vmem:[#allocation2 + $0xf8] sm:$0xff]  ;;  %v86_v57 = vld [vmem:[#allocation2 + $0xe0] sm:$0xff]  ;;  %v88_v58 = vld [vmem:[#allocation2 + $0xf0] sm:$0xff] }
  0x2f   :  { %199 = vmatpush1.msra.mxu0 %v58_v33  ;;  %270 = vmatpush1.msra.mxu1 %v60_v34  ;;  %v79_v59 = vld [vmem:[#allocation2 + $0xa8] sm:$0xff]  ;;  %v81_v60 = vld [vmem:[#allocation2 + $0xb8] sm:$0xff]  ;;  %v78_v61 = vld [vmem:[#allocation2 + $0xa0] sm:$0xff] }
  0x30   :  { %326 = vmatprep.subr.mxu0 %v119_v35  ;;  %397 = vmatprep.subr.mxu1 %v121_v36  ;;  %v80_v62 = vld [vmem:[#allocation2 + $0xb0] sm:$0xff]  ;;  %v71_v63 = vld [vmem:[#allocation2 + $0x68] sm:$0xff]  ;;  %v73_v0 = vld [vmem:[#allocation2 + $0x78] sm:$0xff] }
  0x31   :  { %v70_v2 = vld [vmem:[#allocation2 + $0x60] sm:$0xff]  ;;  %v72_v3 = vld [vmem:[#allocation2 + $0x70] sm:$0xff]  ;;  %v63_v4 = vld [vmem:[#allocation2 + $0x28] sm:$0xff] }
  0x32   :  { %v65_v5 = vld [vmem:[#allocation2 + $0x38] sm:$0xff]  ;;  %v62_v6 = vld [vmem:[#allocation2 + $0x20] sm:$0xff]  ;;  %v64_v7 = vld [vmem:[#allocation2 + $0x30] sm:$0xff] }
  0x33   :  { %v491_v8 = vld [vmem:[#allocation5 + $0xf8] sm:$0xff]  ;;  %v490_v12 = vld [vmem:[#allocation5 + $0xf0] sm:$0xff]  ;;  %v489_v16 = vld [vmem:[#allocation5 + $0xe8] sm:$0xff] }
  0x34   :  { %v523_v9 = vld [vmem:[#allocation5 + $0x1f8] sm:$0xff]  ;;  %v522_v13 = vld [vmem:[#allocation5 + $0x1f0] sm:$0xff]  ;;  %v521_v17 = vld [vmem:[#allocation5 + $0x1e8] sm:$0xff] }
  0x35   :  { %v475_v10 = vld [vmem:[#allocation5 + $0x78] sm:$0xff]  ;;  %v474_v14 = vld [vmem:[#allocation5 + $0x70] sm:$0xff]  ;;  %v505_v18 = vld [vmem:[#allocation5 + $0x168] sm:$0xff] }
  0x36   :  { %v507_v11 = vld [vmem:[#allocation5 + $0x178] sm:$0xff]  ;;  %v506_v15 = vld [vmem:[#allocation5 + $0x170] sm:$0xff]  ;;  %v488_v19 = vld [vmem:[#allocation5 + $0xe0] sm:$0xff] }
  0x37   :  { %v520_v20 = vld [vmem:[#allocation5 + $0x1e0] sm:$0xff]  ;;  %v487_v23 = vld [vmem:[#allocation5 + $0xd8] sm:$0xff]  ;;  %v486_v27 = vld [vmem:[#allocation5 + $0xd0] sm:$0xff] }
  0x38   :  { %v472_v21 = vld [vmem:[#allocation5 + $0x60] sm:$0xff]  ;;  %v519_v24 = vld [vmem:[#allocation5 + $0x1d8] sm:$0xff]  ;;  %v518_v28 = vld [vmem:[#allocation5 + $0x1d0] sm:$0xff] }
  0x39   :  { %v504_v22 = vld [vmem:[#allocation5 + $0x160] sm:$0xff]  ;;  %v471_v25 = vld [vmem:[#allocation5 + $0x58] sm:$0xff]  ;;  %v470_v29 = vld [vmem:[#allocation5 + $0x50] sm:$0xff] }
  0x3a   :  { %v503_v26 = vld [vmem:[#allocation5 + $0x158] sm:$0xff]  ;;  %v502_v30 = vld [vmem:[#allocation5 + $0x150] sm:$0xff]  ;;  %v485_v31 = vld [vmem:[#allocation5 + $0xc8] sm:$0xff] }
  0x3b   :  { %v517_v32 = vld [vmem:[#allocation5 + $0x1c8] sm:$0xff]  ;;  %v484_v35 = vld [vmem:[#allocation5 + $0xc0] sm:$0xff] }
  0x3c   :  { %v469_v33 = vld [vmem:[#allocation5 + $0x48] sm:$0xff]  ;;  %v516_v36 = vld [vmem:[#allocation5 + $0x1c0] sm:$0xff] }
  0x3d   :  { %v501_v34 = vld [vmem:[#allocation5 + $0x148] sm:$0xff] }
  0x9a   :  { %v54_v39 = vpop.permute.xlu0 %53 }
  0x9b   :  { %vm55_vm1 = vcmp.eq.s32.totalorder %v54_v39, %v1184_v38  ;;  %v468_v39 = vld [vmem:[#allocation5 + $0x40] sm:$0xff] }
  0x9c   :  { %v1188_v42 = vsel %vm55_vm1, 1.0, %v1139_v1 }
  0x9d   :  { %907 = vmatmul.mubr.msk.f32.vlgmr.msra.gmra.mxu0 %vm164_vm0, %v1188_v42  ;;  %908 = vmatmul.mubr.msk.f32.vlgmr.msra.gmra.mxu1 %vm164_vm0, %v1188_v42 }
  0x9e   :  { %327 = vmatpush1.msra.mxu0 %v118_v40  ;;  %398 = vmatpush1.msra.mxu1 %v120_v41  ;;  %v500_v40 = vld [vmem:[#allocation5 + $0x140] sm:$0xff]  ;;  %v483_v41 = vld [vmem:[#allocation5 + $0xb8] sm:$0xff] }
  0x9f   :  { %328 = vmatprep.subr.mxu0 %v111_v43  ;;  %399 = vmatprep.subr.mxu1 %v113_v44  ;;  %v467_v43 = vld [vmem:[#allocation5 + $0x38] sm:$0xff] }
  0xa0   :  { %329 = vmatpush1.msra.mxu0 %v110_v45  ;;  %400 = vmatpush1.msra.mxu1 %v112_v46  ;;  %v499_v44 = vld [vmem:[#allocation5 + $0x138] sm:$0xff]  ;;  %v482_v45 = vld [vmem:[#allocation5 + $0xb0] sm:$0xff] }
  0xa1   :  { %330 = vmatprep.subr.mxu0 %v103_v47  ;;  %401 = vmatprep.subr.mxu1 %v105_v48  ;;  %v514_v46 = vld [vmem:[#allocation5 + $0x1b0] sm:$0xff] }
  0xa2   :  { %331 = vmatpush1.msra.mxu0 %v102_v49  ;;  %402 = vmatpush1.msra.mxu1 %v104_v50  ;;  %v466_v47 = vld [vmem:[#allocation5 + $0x30] sm:$0xff]  ;;  %v481_v49 = vld [vmem:[#allocation5 + $0xa8] sm:$0xff] }
  0xa3   :  { %332 = vmatprep.subr.mxu0 %v95_v51  ;;  %403 = vmatprep.subr.mxu1 %v97_v52  ;;  %v498_v48 = vld [vmem:[#allocation5 + $0x130] sm:$0xff]  ;;  %v513_v50 = vld [vmem:[#allocation5 + $0x1a8] sm:$0xff] }
  0xa4   :  { %333 = vmatpush1.msra.mxu0 %v94_v53  ;;  %404 = vmatpush1.msra.mxu1 %v96_v54  ;;  %v465_v51 = vld [vmem:[#allocation5 + $0x28] sm:$0xff]  ;;  %v480_v53 = vld [vmem:[#allocation5 + $0xa0] sm:$0xff] }
  0xa5   :  { %334 = vmatprep.subr.mxu0 %v87_v55  ;;  %405 = vmatprep.subr.mxu1 %v89_v56  ;;  %v497_v52 = vld [vmem:[#allocation5 + $0x128] sm:$0xff]  ;;  %v512_v54 = vld [vmem:[#allocation5 + $0x1a0] sm:$0xff] }
  0xa6   :  { %335 = vmatpush1.msra.mxu0 %v86_v57  ;;  %406 = vmatpush1.msra.mxu1 %v88_v58  ;;  %v464_v55 = vld [vmem:[#allocation5 + $0x20] sm:$0xff]  ;;  %v479_v57 = vld [vmem:[#allocation5 + $0x98] sm:$0xff] }
  0xa7   :  { %336 = vmatprep.subr.mxu0 %v79_v59  ;;  %407 = vmatprep.subr.mxu1 %v81_v60  ;;  %v496_v56 = vld [vmem:[#allocation5 + $0x120] sm:$0xff]  ;;  %v511_v58 = vld [vmem:[#allocation5 + $0x198] sm:$0xff] }
  0xa8   :  { %337 = vmatpush1.msra.mxu0 %v78_v61  ;;  %408 = vmatpush1.msra.mxu1 %v80_v62  ;;  %v463_v59 = vld [vmem:[#allocation5 + $0x18] sm:$0xff]  ;;  %v478_v61 = vld [vmem:[#allocation5 + $0x90] sm:$0xff] }
  0xa9   :  { %338 = vmatprep.subr.mxu0 %v71_v63  ;;  %409 = vmatprep.subr.mxu1 %v73_v0  ;;  %v495_v60 = vld [vmem:[#allocation5 + $0x118] sm:$0xff]  ;;  %v510_v62 = vld [vmem:[#allocation5 + $0x190] sm:$0xff] }
  0xaa   :  { %339 = vmatpush1.msra.mxu0 %v70_v2  ;;  %410 = vmatpush1.msra.mxu1 %v72_v3  ;;  %v462_v63 = vld [vmem:[#allocation5 + $0x10] sm:$0xff]  ;;  %v477_v2 = vld [vmem:[#allocation5 + $0x88] sm:$0xff] }
  0xab   :  { %340 = vmatprep.subr.mxu0 %v63_v4  ;;  %411 = vmatprep.subr.mxu1 %v65_v5  ;;  %v494_v0 = vld [vmem:[#allocation5 + $0x110] sm:$0xff]  ;;  %v509_v3 = vld [vmem:[#allocation5 + $0x188] sm:$0xff] }
  0xac   :  { %341 = vmatpush1.msra.mxu0 %v62_v6  ;;  %374 = vmatprep.mubr.f32.mxu0 %v1139_v1  ;;  %v461_v4 = vld [vmem:[#allocation5 + $0x8] sm:$0xff]  ;;  %v476_v6 = vld [vmem:[#allocation5 + $0x80] sm:$0xff] }
  0xad   :  { %412 = vmatpush1.msra.mxu1 %v64_v7  ;;  %445 = vmatprep.mubr.f32.mxu1 %v1139_v1  ;;  %v473_v1 = vld [vmem:[#allocation5 + $0x68] sm:$0xff]  ;;  %v508_v7 = vld [vmem:[#allocation5 + $0x180] sm:$0xff] }
  0xae   :  { %909 = vmatmul.mubr.msk.f32.vlgmr.msra.gmra.mxu0 %vm164_vm0, %v1188_v42  ;;  %910 = vmatmul.mubr.msk.f32.vlgmr.msra.gmra.mxu1 %vm164_vm0, %v1188_v42  ;;  %v515_v42 = vld [vmem:[#allocation5 + $0x1b8] sm:$0xff]  ;;  %v493_v5 = vld [vmem:[#allocation5 + $0x108] sm:$0xff] }
  0xaf   :  { %912 = vmatprep.subr.mxu0 %v491_v8  ;;  %947 = vmatprep.subr.mxu1 %v523_v9  ;;  %v460_v8 = vld [vmem:[#allocation5] sm:$0xff] }
  0xb0   :  { %913 = vmatpush3.msra.mxu0 %v475_v10  ;;  %948 = vmatpush3.msra.mxu1 %v507_v11  ;;  %v492_v9 = vld [vmem:[#allocation5 + $0x100] sm:$0xff]  ;;  %v555_v10 = vld [vmem:[#allocation5 + $0x2f8] sm:$0xff] }
  0xb1   :  { %914 = vmatprep.subr.mxu0 %v490_v12  ;;  %949 = vmatprep.subr.mxu1 %v522_v13  ;;  %v587_v11 = vld [vmem:[#allocation5 + $0x3f8] sm:$0xff]  ;;  %v1201_v12 = vshrl.u32 %v50_v37, 7 }
  0xb2   :  { %915 = vmatpush3.msra.mxu0 %v474_v14  ;;  %950 = vmatpush3.msra.mxu1 %v506_v15  ;;  %v1208_v15 = vld [vmem:[%s1240_s2] sm:$0xff] }
  0xb3   :  { %916 = vmatprep.subr.mxu0 %v489_v16  ;;  %951 = vmatprep.subr.mxu1 %v521_v17  ;;  %v126_v13 = vsub.s32 0, %v1201_v12  ;;  %v134_v14 = vsub.s32 2, %v1201_v12  ;;  %v130_v16 = vsub.s32 1, %v1201_v12  ;;  %v138_v17 = vsub.s32 3, %v1201_v12 }
  0xb4   :  { %917 = vmatpush3.msra.mxu0 %v473_v1  ;;  %952 = vmatpush3.msra.mxu1 %v505_v18 }
  0xb5   :  { %918 = vmatprep.subr.mxu0 %v488_v19  ;;  %953 = vmatprep.subr.mxu1 %v520_v20  ;;  %v127_v1 = vrot.slane %v1208_v15, %v126_v13  ;;  %v135_v18 = vrot.slane %v1208_v15, %v134_v14  ;;  %v131_v37 = vrot.slane %v1208_v15, %v130_v16  ;;  %v547_v14 = vld [vmem:[#allocation5 + $0x2b8] sm:$0xff] }
  0xb6   :  { %919 = vmatpush3.msra.mxu0 %v472_v21  ;;  %954 = vmatpush3.msra.mxu1 %v504_v22  ;;  %v139_v19 = vrot.slane %v1208_v15, %v138_v17  ;;  %v579_v16 = vld [vmem:[#allocation5 + $0x3b8] sm:$0xff] }
  0xb7   :  { %920 = vmatprep.subr.mxu0 %v487_v23  ;;  %955 = vmatprep.subr.mxu1 %v519_v24  ;;  %v531_v17 = vld [vmem:[#allocation5 + $0x238] sm:$0xff] }
  0xb8   :  { %921 = vmatpush3.msra.mxu0 %v471_v25  ;;  %956 = vmatpush3.msra.mxu1 %v503_v26 }
  0xb9   :  { %922 = vmatprep.subr.mxu0 %v486_v27  ;;  %957 = vmatprep.subr.mxu1 %v518_v28 }
  0xba   :  { %923 = vmatpush3.msra.mxu0 %v470_v29  ;;  %958 = vmatpush3.msra.mxu1 %v502_v30 }
  0xbb   :  { %924 = vmatprep.subr.mxu0 %v485_v31  ;;  %959 = vmatprep.subr.mxu1 %v517_v32  ;;  %v539_v32 = vld [vmem:[#allocation5 + $0x278] sm:$0xff] }
  0xbc   :  { %925 = vmatpush3.msra.mxu0 %v469_v33  ;;  %960 = vmatpush3.msra.mxu1 %v501_v34  ;;  %v571_v33 = vld [vmem:[#allocation5 + $0x378] sm:$0xff]  ;;  %v554_v34 = vld [vmem:[#allocation5 + $0x2f0] sm:$0xff] }
  0xbd   :  { %926 = vmatprep.subr.mxu0 %v484_v35  ;;  %961 = vmatprep.subr.mxu1 %v516_v36  ;;  %v586_v35 = vld [vmem:[#allocation5 + $0x3f0] sm:$0xff] }
  0xbe   :  { %927 = vmatpush3.msra.mxu0 %v468_v39  ;;  %962 = vmatpush3.msra.mxu1 %v500_v40  ;;  %v538_v36 = vld [vmem:[#allocation5 + $0x270] sm:$0xff]  ;;  %v553_v40 = vld [vmem:[#allocation5 + $0x2e8] sm:$0xff] }
  0xbf   :  { %928 = vmatprep.subr.mxu0 %v483_v41  ;;  %963 = vmatprep.subr.mxu1 %v515_v42  ;;  %v570_v39 = vld [vmem:[#allocation5 + $0x370] sm:$0xff]  ;;  %v585_v41 = vld [vmem:[#allocation5 + $0x3e8] sm:$0xff] }
  0xc0   :  { %929 = vmatpush3.msra.mxu0 %v467_v43  ;;  %964 = vmatpush3.msra.mxu1 %v499_v44  ;;  %v537_v42 = vld [vmem:[#allocation5 + $0x268] sm:$0xff]  ;;  %v552_v44 = vld [vmem:[#allocation5 + $0x2e0] sm:$0xff] }
  0xc1   :  { %930 = vmatprep.subr.mxu0 %v482_v45  ;;  %965 = vmatprep.subr.mxu1 %v514_v46  ;;  %v569_v43 = vld [vmem:[#allocation5 + $0x368] sm:$0xff]  ;;  %v584_v45 = vld [vmem:[#allocation5 + $0x3e0] sm:$0xff] }
  0xc2   :  { %931 = vmatpush3.msra.mxu0 %v466_v47  ;;  %966 = vmatpush3.msra.mxu1 %v498_v48  ;;  %v536_v46 = vld [vmem:[#allocation5 + $0x260] sm:$0xff]  ;;  %v146_v48 = vsub.s32 5, %v1201_v12 }
  0xc3   :  { %932 = vmatprep.subr.mxu0 %v481_v49  ;;  %967 = vmatprep.subr.mxu1 %v513_v50  ;;  %v568_v47 = vld [vmem:[#allocation5 + $0x360] sm:$0xff]  ;;  %v154_v49 = vsub.s32 7, %v1201_v12  ;;  %v551_v50 = vld [vmem:[#allocation5 + $0x2d8] sm:$0xff] }
  0xc4   :  { %933 = vmatpush3.msra.mxu0 %v465_v51  ;;  %968 = vmatpush3.msra.mxu1 %v497_v52  ;;  %v583_v51 = vld [vmem:[#allocation5 + $0x3d8] sm:$0xff] }
  0xc5   :  { %934 = vmatprep.subr.mxu0 %v480_v53  ;;  %969 = vmatprep.subr.mxu1 %v512_v54  ;;  %v535_v52 = vld [vmem:[#allocation5 + $0x258] sm:$0xff]  ;;  %v550_v54 = vld [vmem:[#allocation5 + $0x2d0] sm:$0xff] }
  0xc6   :  { %935 = vmatpush3.msra.mxu0 %v464_v55  ;;  %970 = vmatpush3.msra.mxu1 %v496_v56  ;;  %v567_v53 = vld [vmem:[#allocation5 + $0x358] sm:$0xff]  ;;  %v582_v55 = vld [vmem:[#allocation5 + $0x3d0] sm:$0xff]  ;;  %v147_v56 = vrot.slane %v1208_v15, %v146_v48  ;;  %v572_v48 = vld [vmem:[#allocation5 + $0x380] sm:$0xff] }
  0xc7   :  { %936 = vmatprep.subr.mxu0 %v479_v57  ;;  %971 = vmatprep.subr.mxu1 %v511_v58  ;;  %v155_v57 = vrot.slane %v1208_v15, %v154_v49  ;;  %v534_v58 = vld [vmem:[#allocation5 + $0x250] sm:$0xff]  ;;  %v524_v49 = vld [vmem:[#allocation5 + $0x200] sm:$0xff] }
  0xc8   :  { %937 = vmatpush3.msra.mxu0 %v463_v59  ;;  %972 = vmatpush3.msra.mxu1 %v495_v60  ;;  %v566_v59 = vld [vmem:[#allocation5 + $0x350] sm:$0xff] }
  0xc9   :  { %938 = vmatprep.subr.mxu0 %v478_v61  ;;  %973 = vmatprep.subr.mxu1 %v510_v62  ;;  %v549_v62 = vld [vmem:[#allocation5 + $0x2c8] sm:$0xff] }
  0xca   :  { %939 = vmatpush3.msra.mxu0 %v462_v63  ;;  %974 = vmatpush3.msra.mxu1 %v494_v0  ;;  %v581_v63 = vld [vmem:[#allocation5 + $0x3c8] sm:$0xff] }
  0xcb   :  { %940 = vmatprep.subr.mxu0 %v477_v2  ;;  %975 = vmatprep.subr.mxu1 %v509_v3  ;;  %v533_v0 = vld [vmem:[#allocation5 + $0x248] sm:$0xff] }
  0xcc   :  { %941 = vmatpush3.msra.mxu0 %v461_v4  ;;  %976 = vmatpush3.msra.mxu1 %v493_v5  ;;  %v565_v2 = vld [vmem:[#allocation5 + $0x348] sm:$0xff]  ;;  %v548_v5 = vld [vmem:[#allocation5 + $0x2c0] sm:$0xff] }
  0xcd   :  { %942 = vmatprep.subr.mxu0 %v476_v6  ;;  %977 = vmatprep.subr.mxu1 %v508_v7  ;;  %v580_v6 = vld [vmem:[#allocation5 + $0x3c0] sm:$0xff] }
  0xce   :  { %943 = vmatpush3.msra.mxu0 %v460_v8  ;;  %978 = vmatpush3.msra.mxu1 %v492_v9  ;;  %v532_v9 = vld [vmem:[#allocation5 + $0x240] sm:$0xff] }
  0xcf   :  { %982 = vmatprep.subr.mxu0 %v555_v10  ;;  %1017 = vmatprep.subr.mxu1 %v587_v11  ;;  %v564_v10 = vld [vmem:[#allocation5 + $0x340] sm:$0xff] }
 0x15d   :  { %v234_v20 = vpop.f32.mrf.mxu0  ;;  %v305_v21 = vpop.f32.mrf.mxu1 }
 0x15e   :  { %v235_v22 = vadd.f32 %v234_v20, %v127_v1  ;;  %v306_v23 = vadd.f32 %v305_v21, %v135_v18  ;;  %v563_v1 = vld [vmem:[#allocation5 + $0x338] sm:$0xff]  ;;  %v546_v18 = vld [vmem:[#allocation5 + $0x2b0] sm:$0xff]  ;;  %v545_v21 = vld [vmem:[#allocation5 + $0x2a8] sm:$0xff] }
 0x15f   :  { %v236_v24 = vpop.f32.mrf.mxu0  ;;  %v307_v25 = vpop.f32.mrf.mxu1  ;;  %v562_v20 = vld [vmem:[#allocation5 + $0x330] sm:$0xff] }
 0x160   :  { %v237_v26 = vadd.f32 %v236_v24, %v131_v37  ;;  %v308_v27 = vadd.f32 %v307_v25, %v139_v19  ;;  %v452_v30 = vmax.f32 %v235_v22, 0.0  ;;  %v454_v31 = vmax.f32 %v306_v23, 0.0  ;;  %v578_v37 = vld [vmem:[#allocation5 + $0x3b0] sm:$0xff]  ;;  %v577_v22 = vld [vmem:[#allocation5 + $0x3a8] sm:$0xff] }
 0x161   :  { %v530_v19 = vld [vmem:[#allocation5 + $0x230] sm:$0xff]  ;;  %v142_v23 = vsub.s32 4, %v1201_v12  ;;  %v150_v24 = vsub.s32 6, %v1201_v12  ;;  %v529_v25 = vld [vmem:[#allocation5 + $0x228] sm:$0xff] }
 0x162   :  { %v453_v28 = vmax.f32 %v237_v26, 0.0  ;;  %v455_v29 = vmax.f32 %v308_v27, 0.0  ;;  %v561_v26 = vld [vmem:[#allocation5 + $0x328] sm:$0xff]  ;;  %v544_v27 = vld [vmem:[#allocation5 + $0x2a0] sm:$0xff] }
 0x163   :  { %v151_v12 = vrot.slane %v1208_v15, %v150_v24 }
 0x164   :  { %659 = vmatprep.mubr.f32.mxu0 %v453_v28  ;;  %729 = vmatprep.mubr.f32.mxu1 %v455_v29  ;;  %v576_v28 = vld [vmem:[#allocation5 + $0x3a0] sm:$0xff] }
 0x165   :  { %660 = vmatmul.mubr.f32.vlgmr.msra.gmra.mxu0 %v452_v30  ;;  %730 = vmatmul.mubr.f32.vlgmr.msra.gmra.mxu1 %v454_v31  ;;  %v528_v29 = vld [vmem:[#allocation5 + $0x220] sm:$0xff]  ;;  %v543_v31 = vld [vmem:[#allocation5 + $0x298] sm:$0xff] }
 0x166   :  { %983 = vmatpush3.msra.mxu0 %v539_v32  ;;  %1018 = vmatpush3.msra.mxu1 %v571_v33  ;;  %v560_v30 = vld [vmem:[#allocation5 + $0x320] sm:$0xff]  ;;  %v575_v32 = vld [vmem:[#allocation5 + $0x398] sm:$0xff]  ;;  %v143_v33 = vrot.slane %v1208_v15, %v142_v23 }
 0x167   :  { %984 = vmatprep.subr.mxu0 %v554_v34  ;;  %1019 = vmatprep.subr.mxu1 %v586_v35  ;;  %v527_v34 = vld [vmem:[#allocation5 + $0x218] sm:$0xff] }
 0x168   :  { %985 = vmatpush3.msra.mxu0 %v538_v36  ;;  %1020 = vmatpush3.msra.mxu1 %v570_v39  ;;  %v559_v35 = vld [vmem:[#allocation5 + $0x318] sm:$0xff]  ;;  %v542_v36 = vld [vmem:[#allocation5 + $0x290] sm:$0xff] }
 0x169   :  { %986 = vmatprep.subr.mxu0 %v553_v40  ;;  %1021 = vmatprep.subr.mxu1 %v585_v41  ;;  %v574_v39 = vld [vmem:[#allocation5 + $0x390] sm:$0xff] }
 0x16a   :  { %987 = vmatpush3.msra.mxu0 %v537_v42  ;;  %1022 = vmatpush3.msra.mxu1 %v569_v43  ;;  %v526_v40 = vld [vmem:[#allocation5 + $0x210] sm:$0xff]  ;;  %v541_v42 = vld [vmem:[#allocation5 + $0x288] sm:$0xff] }
 0x16b   :  { %988 = vmatprep.subr.mxu0 %v552_v44  ;;  %1023 = vmatprep.subr.mxu1 %v584_v45  ;;  %v558_v41 = vld [vmem:[#allocation5 + $0x310] sm:$0xff]  ;;  %v573_v43 = vld [vmem:[#allocation5 + $0x388] sm:$0xff] }
 0x16c   :  { %989 = vmatpush3.msra.mxu0 %v536_v46  ;;  %1024 = vmatpush3.msra.mxu1 %v568_v47  ;;  %v525_v45 = vld [vmem:[#allocation5 + $0x208] sm:$0xff]  ;;  %v540_v47 = vld [vmem:[#allocation5 + $0x280] sm:$0xff] }
 0x16d   :  { %990 = vmatprep.subr.mxu0 %v551_v50  ;;  %1025 = vmatprep.subr.mxu1 %v583_v51  ;;  %v557_v46 = vld [vmem:[#allocation5 + $0x308] sm:$0xff]  ;;  %v556_v50 = vld [vmem:[#allocation5 + $0x300] sm:$0xff] }
 0x16e   :  { %v1220_v60 = vpop.f32.mrf.mxu0  ;;  %v1222_v61 = vpop.f32.mrf.mxu1  ;;  %991 = vmatpush3.msra.mxu0 %v535_v52  ;;  %1026 = vmatpush3.msra.mxu1 %v567_v53 }
 0x16f   :  { %992 = vmatprep.subr.mxu0 %v550_v54  ;;  %1027 = vmatprep.subr.mxu1 %v582_v55  ;;  %v377_v44 = vadd.f32 %v1220_v60, %v143_v33  ;;  %v448_v15 = vadd.f32 %v1222_v61, %v151_v12 }
 0x170   :  { %v378_v3 = vpop.f32.mrf.mxu0  ;;  %v449_v4 = vpop.f32.mrf.mxu1  ;;  %993 = vmatpush3.msra.mxu0 %v534_v58  ;;  %1028 = vmatpush3.msra.mxu1 %v566_v59 }
 0x171   :  { %v379_v7 = vadd.f32 %v378_v3, %v147_v56  ;;  %v450_v8 = vadd.f32 %v449_v4, %v155_v57  ;;  %994 = vmatprep.subr.mxu0 %v549_v62  ;;  %1029 = vmatprep.subr.mxu1 %v581_v63  ;;  %v456_v51 = vmax.f32 %v377_v44, 0.0  ;;  %v458_v52 = vmax.f32 %v448_v15, 0.0  ;;  %v911_v57 = vld [vmem:[%s1242_s4] ss:$0 sm:$0xff]  ;;  %s1140_s4 = smov [#allocation7]  }
 0x172   :  { %995 = vmatpush3.msra.mxu0 %v533_v0  ;;  %1030 = vmatpush3.msra.mxu1 %v565_v2  ;;  %s896_s9 = sshll.u32 %s1140_s4, 4  ;;  %s897_s9 = int_to_ptr.vmem [resolvable:$true] %s896_s9 }
 0x173   :  { %v457_v11 = vmax.f32 %v379_v7, 0.0  ;;  %v459_v13 = vmax.f32 %v450_v8, 0.0  ;;  %996 = vmatprep.subr.mxu0 %v548_v5  ;;  %1031 = vmatprep.subr.mxu1 %v580_v6  ;;  %s1106_s10 = scalar_lea.vmem %s897_s9, 128  ;;  %p1111_p11 = scmp.lt.s32.totalorder %s897_s9, %s897_s9 }
 0x174   :  { %997 = vmatpush3.msra.mxu0 %v532_v9  ;;  %1032 = vmatpush3.msra.mxu1 %v564_v10  ;;  %p1107_p10 = scmp.ne.s32.totalorder %s897_s9, %s1106_s10  ;;  %p1112_p12 = scmp.lt.s32.totalorder %s1106_s10, %s1106_s10 }
 0x175   :  { %799 = vmatprep.mubr.f32.mxu0 %v457_v11  ;;  %869 = vmatprep.mubr.f32.mxu1 %v459_v13 }
 0x176   :  { %998 = vmatprep.subr.mxu0 %v547_v14  ;;  %1033 = vmatprep.subr.mxu1 %v579_v16  ;;  %p1113_p13 = por %p1112_p12, %p1111_p11 }
 0x177   :  { %999 = vmatpush3.msra.mxu0 %v531_v17  ;;  %1034 = vmatpush3.msra.mxu1 %v563_v1 }
 0x178   :  { %1000 = vmatprep.subr.mxu0 %v546_v18  ;;  %1035 = vmatprep.subr.mxu1 %v578_v37  ;;  %p1114_p0 = pnand %p1113_p13, %p1107_p10 }
 0x179   :  { %1001 = vmatpush3.msra.mxu0 %v530_v19  ;;  %1036 = vmatpush3.msra.mxu1 %v562_v20 }
 0x17a   :  { %1002 = vmatprep.subr.mxu0 %v545_v21  ;;  %1037 = vmatprep.subr.mxu1 %v577_v22 }
 0x17b   :  { %1003 = vmatpush3.msra.mxu0 %v529_v25  ;;  %1038 = vmatpush3.msra.mxu1 %v561_v26 }
 0x17c   :  { %1004 = vmatprep.subr.mxu0 %v544_v27  ;;  %1039 = vmatprep.subr.mxu1 %v576_v28 }
 0x17d   :  { %1005 = vmatpush3.msra.mxu0 %v528_v29  ;;  %1040 = vmatpush3.msra.mxu1 %v560_v30 }
 0x17e   :  { %1006 = vmatprep.subr.mxu0 %v543_v31  ;;  %1041 = vmatprep.subr.mxu1 %v575_v32 }
 0x17f   :  { %1007 = vmatpush3.msra.mxu0 %v527_v34  ;;  %1042 = vmatpush3.msra.mxu1 %v559_v35 }
 0x180   :  { %1008 = vmatprep.subr.mxu0 %v542_v36  ;;  %1043 = vmatprep.subr.mxu1 %v574_v39 }
 0x181   :  { %1009 = vmatpush3.msra.mxu0 %v526_v40  ;;  %1044 = vmatpush3.msra.mxu1 %v558_v41 }
 0x182   :  { %1010 = vmatprep.subr.mxu0 %v541_v42  ;;  %1045 = vmatprep.subr.mxu1 %v573_v43 }
 0x183   :  { %1011 = vmatpush3.msra.mxu0 %v525_v45  ;;  %1046 = vmatpush3.msra.mxu1 %v557_v46 }
 0x184   :  { %1012 = vmatprep.subr.mxu0 %v540_v47  ;;  %1047 = vmatprep.subr.mxu1 %v572_v48 }
 0x185   :  { %1013 = vmatpush3.msra.mxu0 %v524_v49  ;;  %1048 = vmatpush3.msra.mxu1 %v556_v50 }
 0x186   :  { %800 = vmatmul.mubr.f32.vlgmr.msra.gmra.mxu0 %v456_v51  ;;  %870 = vmatmul.mubr.f32.vlgmr.msra.gmra.mxu1 %v458_v52 }
 0x225   :  { %v944_v53 = vpop.f32.mrf.mxu0  ;;  %v979_v55 = vpop.f32.mrf.mxu1 }
 0x227   :  { %v945_v54 = vpop.f32.mrf.mxu0  ;;  %v980_v58 = vpop.f32.mrf.mxu1 }
 0x228   :  { %v946_v56 = vadd.f32 %v945_v54, %v944_v53  ;;  %v981_v62 = vadd.f32 %v980_v58, %v979_v55 }
 0x22a   :  { %v662_v59 = vadd.f32 %v946_v56, %v911_v57 }
 0x22c   :  { %v732_v2 = vadd.f32 %v981_v62, %v662_v59 }
 0x246   :  { %v1014_v60 = vpop.f32.mrf.mxu0  ;;  %v1049_v61 = vpop.f32.mrf.mxu1 }
 0x248   :  { %v1015_v63 = vpop.f32.mrf.mxu0  ;;  %v1050_v0 = vpop.f32.mrf.mxu1 }
 0x249   :  { %v1016_v3 = vadd.f32 %v1015_v63, %v1014_v60  ;;  %v1051_v5 = vadd.f32 %v1050_v0, %v1049_v61 }
 0x24b   :  { %v802_v4 = vadd.f32 %v1016_v3, %v732_v2 }
 0x24d   :  { %v872_v6 = vadd.f32 %v1051_v5, %v802_v4 }
 0x24f   :  { %v876_v7 = vsel %vm875_vm2, %v872_v6, -inf }
 0x250   :  { %877 = vmax.xlane.f32.xlu0 %v876_v7 }
 0x2d9   :  { %v878_v8 = vpop.xlane.xlu0 %877 }
 0x2da   :  { %v879_v9 = vsub.f32 %v876_v7, %v878_v8 }
 0x2dc   :  { %v880_v10 = vmul.f32 1.442695, %v879_v9 }
 0x2de   :  { %1062 = vpow2.f32 %v880_v10 }
 0x2eb   :  { %v1063_v11 = vpop.eup %1062 }
 0x2ec   :  { %882 = vadd.xlane.f32.xlu1 %v1063_v11 }
 0x375   :  { %v883_v13 = vpop.xlane.xlu1 %882 }
 0x376   :  { %1064 = vrcp.f32 %v883_v13 }
 0x383   :  { %v1065_v14 = vpop.eup %1064 }
 0x384   :  { %v885_v16 = vmul.f32 %v1065_v14, %v1063_v11 }
 0x386   :  { %886 = vrot.lane.b32.xlu1 %v885_v16, %s1134_s22 }
 0x3f8   :  { %v887_v17 = vpop.permute.xlu1 %886 }
 0x3f9   :  { %v888_v1 = vadd.f32 %v887_v17, %v872_v6 }
 0x3fb   :  { %889 = vst [vmem:[#allocation7] sm:$0xff] %v888_v1 }
 0x3fc   :  { %1117 = shalt.err (!%p1114_p0)
}
 0x3fd   :  { %899 = dma.vmem_to_hbm [thread:$0]  %s897_s9, 128, %s1243_s5, [#allocation4]  }
 0x3fe   :  { %1130 = dma.done.wait [#allocation4], 128  }
 0x3ff   :  { %1131 = vsyncadd [#allocation4], 4294967168 }
 0x400   :  { %903 = vsyncpa [#allocation3], 1 }
 0x401   :  { %904 = vsyncpa [#allocation6], 1 }
 0x402   :  { %905 = vsyncpa [#allocation4], 1 }

</bundles_post_ra>
